<compile_context>
chip_gen: v7x
topology: tpu7x:2x2x1
jax: 0.10.0
libtpu: 0.0.40
codegen_flags: <defaults>
</compile_context>

<pallas_src>
import functools

import numpy as np
import jax
import jax.numpy as jnp
from jax import lax
from jax.experimental import pallas as pl
from jax.experimental.pallas import tpu as pltpu


def _round_up(x, m):
    return (x + m - 1) // m * m


def lstm_head_kernel(blk_len_ref,                       # [n_bblk] int32 (SMEM, prefetched)
                     x_ref, mask_ref, wih_ref, whh_ref, b_ref, wout_ref, bout_ref,
                     o_ref,
                     xg_scr, hall_scr, h_scr, c_scr,
                     *, t_chunk, pad_value):
    """One (batch block, time chunk) grid cell.

    x_ref:    [TC*Bblk, Hp]  bf16 embedded inputs (row = t*Bblk + b, lane-dense)
    mask_ref: [TC*Bblk, 1]   1.0 where t < seq_length[b], else 0.0
    wih_ref:  [Hp, 4*Hp]     bf16 input->gates weights (pre-transposed, i,f,g,o)
    whh_ref:  [Hp, 4*Hp]     bf16 hidden->gates weights (pre-transposed)
    b_ref:    [1, 4*Hp]      f32 bias_ih + bias_hh (per-gate padded)
    wout_ref: [Hp, Op]       bf16 output projection (pre-transposed, zero-padded)
    bout_ref: [1, Op]        f32 output bias (-1e30 on padded lanes)
    o_ref:    [TC*Bblk, Op]  f32 log-probabilities (lane-dense output)
    h_scr/c_scr: [Bblk, Hp]  f32 LSTM state carried across time chunks
    """
    B_blk, H_pad = h_scr.shape
    O_pad = o_ref.shape[-1]
    b_idx = pl.program_id(0)
    t_idx = pl.program_id(1)

    # Reset carried state at the first time chunk of every batch block.
    @pl.when(t_idx == 0)
    def _():
        h_scr[...] = jnp.zeros_like(h_scr)
        c_scr[...] = jnp.zeros_like(c_scr)

    # Real recurrence steps left for this batch block inside this chunk
    # (seq lengths beyond it are fully masked -> skipped on the serial path).
    steps = jnp.minimum(jnp.maximum(blk_len_ref[b_idx] - t_idx * t_chunk, 0), t_chunk)

    @pl.when(steps > 0)
    def _():
        # ---- Phase 1: input projection for the whole chunk (one MXU matmul) ----
        xg_scr[...] = (jnp.dot(x_ref[...], wih_ref[...],
                               preferred_element_type=jnp.float32) + b_ref[...])

        # ---- Phase 2: recurrence; only h_prev @ W_hh stays on the serial path ----
        def step(t, carry):
            row = pl.multiple_of(t * B_blk, B_blk)            # sublane-aligned start
            gates = xg_scr[pl.ds(row, B_blk), :] + jnp.dot(
                h_scr[...].astype(whh_ref.dtype), whh_ref[...],
                preferred_element_type=jnp.float32)           # [Bblk, 4*Hp]

            i_g = jax.nn.sigmoid(gates[:, 0 * H_pad:1 * H_pad])
            f_g = jax.nn.sigmoid(gates[:, 1 * H_pad:2 * H_pad])
            g_g = jnp.tanh(gates[:, 2 * H_pad:3 * H_pad])
            o_g = jax.nn.sigmoid(gates[:, 3 * H_pad:4 * H_pad])

            c_new = f_g * c_scr[...] + i_g * g_g
            h_new = o_g * jnp.tanh(c_new)
            c_scr[...] = c_new
            h_scr[...] = h_new
            hall_scr[pl.ds(row, B_blk), :] = h_new
            return carry

        lax.fori_loop(0, steps, step, 0)

    # ---- Phase 3: pad_packed masking + Linear + LogSoftmax (always runs:
    # masked positions must still produce the projected pad_index row, exactly
    # like pad_packed_sequence -> Linear -> LogSoftmax).  jnp.where also keeps
    # stale/uninitialized hall rows (never-written steps) from leaking through.
    h_out = jnp.where(mask_ref[...] > 0.0, hall_scr[...], jnp.float32(pad_value))
    y = (jnp.dot(h_out.astype(wout_ref.dtype), wout_ref[...],
                 preferred_element_type=jnp.float32) + bout_ref[...])  # [TC*Bblk, Op]
    ymax = jnp.max(y, axis=-1, keepdims=True)
    lse = ymax + jnp.log(jnp.sum(jnp.exp(y - ymax), axis=-1, keepdims=True))
    o_ref[...] = y - lse


def language_recognition_rnn_forward(params, input_ids, seq_lengths, pad_index,
                                     *, b_blk=None, t_chunk=None):
    """Mirrors LanguageRecognitionRNN.forward (eval mode)."""
    seq_lengths = [int(l) for l in seq_lengths]
    t_out = max(seq_lengths)                          # pad_packed total_length=None

    # Embedding lookup (glue, plain JAX gather); dropout = identity (eval).
    emb = jnp.take(params["embedding"], jnp.asarray(input_ids), axis=0)
    emb = emb.astype(jnp.float32)[:, :t_out, :]       # [B, T, H]

    B, T, H = emb.shape
    O = params["w_out"].shape[0]

    # Batch rows per MXU pass: up to 128 (v5e 128x128 sweet spot; pass 256 on
    # v6e/v7x), clamped to the padded batch so tiny batches don't over-pad.
    B_BLK = b_blk if b_blk is not None else min(_round_up(B, 8), 128)
    B_pad = _round_up(B, B_BLK)
    T_CHUNK = t_chunk if t_chunk is not None else min(_round_up(T, 8), 64)
    T_pad = _round_up(T, T_CHUNK)
    H_pad = _round_up(H, 128)
    O_pad = _round_up(O, 128)
    n_bblk = B_pad // B_BLK
    n_tchk = T_pad // T_CHUNK
    NEG = jnp.float32(-1e30)

    # Block-flattened bf16 input: [n_bblk, T_pad*B_BLK, Hp], row = t*B_BLK + b,
    # so each (batch block, time chunk) is one contiguous lane-dense 2-D tile
    # and the kernel never reshapes.
    emb_t = jnp.transpose(emb, (1, 0, 2)).astype(jnp.bfloat16)          # [T, B, H]
    x = jnp.zeros((T_pad, B_pad, H_pad), jnp.bfloat16).at[:T, :B, :H].set(emb_t)
    x = x.reshape(T_pad, n_bblk, B_BLK, H_pad).transpose(1, 0, 2, 3)
    x = x.reshape(n_bblk, T_pad * B_BLK, H_pad)

    # Padding mask + per-batch-block max length (control data, built once).
    lengths_np = np.zeros((B_pad,), np.int32)
    lengths_np[:B] = np.asarray(seq_lengths, np.int32)
    blk_len = jnp.asarray(lengths_np.reshape(n_bblk, B_BLK).max(axis=1), jnp.int32)
    mask_np = (np.arange(T_pad, dtype=np.int32)[:, None] < lengths_np[None, :])
    mask_np = mask_np.astype(np.float32).reshape(T_pad, n_bblk, B_BLK)
    mask_np = mask_np.transpose(1, 0, 2).reshape(n_bblk, T_pad * B_BLK, 1)
    mask_p = jnp.asarray(mask_np)

    # PyTorch LSTM weights [4H, H], gate order (i, f, g, o); pad each gate
    # block to H_pad so in-kernel gate slices are 128-lane aligned. bf16 MXU.
    def pad_gates_t(w):                                # [4H, H] -> [Hp, 4*Hp]
        w4 = jnp.asarray(w, jnp.float32).reshape(4, H, H)
        w4p = jnp.zeros((4, H_pad, H_pad), jnp.float32).at[:, :H, :H].set(w4)
        return jnp.transpose(w4p, (2, 0, 1)).reshape(H_pad, 4 * H_pad)

    w_ih_t = pad_gates_t(params["w_ih"]).astype(jnp.bfloat16)
    w_hh_t = pad_gates_t(params["w_hh"]).astype(jnp.bfloat16)

    b4 = (params["b_ih"] + params["b_hh"]).astype(jnp.float32).reshape(4, H)
    bias = jnp.zeros((4, H_pad), jnp.float32).at[:, :H].set(b4).reshape(1, 4 * H_pad)

    w_out_t = jnp.zeros((H_pad, O_pad), jnp.float32).at[:H, :O].set(
        jnp.asarray(params["w_out"], jnp.float32).T).astype(jnp.bfloat16)
    # Padded logit lanes get a huge negative bias so exp() underflows to 0 and
    # the 128-lane log-softmax equals the log-softmax over the real O lanes.
    b_out = jnp.full((1, O_pad), NEG, jnp.float32).at[0, :O].set(
        jnp.asarray(params["b_out"], jnp.float32))

    # Explicit VMEM budget: pipelined operands double-buffered + scratch, 2x headroom.
    blk_bytes = (T_CHUNK * B_BLK * H_pad * 2            # x block (bf16)
                 + T_CHUNK * B_BLK * 4                  # mask block
                 + T_CHUNK * B_BLK * O_pad * 4          # out block
                 + 2 * H_pad * 4 * H_pad * 2            # W_ih^T, W_hh^T (bf16)
                 + 4 * H_pad * 4 + H_pad * O_pad * 2 + O_pad * 4)
    scr_bytes = (T_CHUNK * B_BLK * 4 * H_pad * 4        # xg
                 + T_CHUNK * B_BLK * H_pad * 4          # hall
                 + 2 * B_BLK * H_pad * 4)               # h, c
    vmem_limit = int(min(max(2 * (2 * blk_bytes + scr_bytes), 32 << 20), 100 << 20))

    grid_spec = pltpu.PrefetchScalarGridSpec(
        num_scalar_prefetch=1,
        grid=(n_bblk, n_tchk),
        in_specs=[
            pl.BlockSpec((None, T_CHUNK * B_BLK, H_pad), lambda b, t, lens: (b, t, 0)),  # x
            pl.BlockSpec((None, T_CHUNK * B_BLK, 1), lambda b, t, lens: (b, t, 0)),      # mask
            pl.BlockSpec((H_pad, 4 * H_pad), lambda b, t, lens: (0, 0)),                 # W_ih^T
            pl.BlockSpec((H_pad, 4 * H_pad), lambda b, t, lens: (0, 0)),                 # W_hh^T
            pl.BlockSpec((1, 4 * H_pad), lambda b, t, lens: (0, 0)),                     # bias
            pl.BlockSpec((H_pad, O_pad), lambda b, t, lens: (0, 0)),                     # W_out^T
            pl.BlockSpec((1, O_pad), lambda b, t, lens: (0, 0)),                         # b_out
        ],
        out_specs=pl.BlockSpec((None, T_CHUNK * B_BLK, O_pad), lambda b, t, lens: (b, t, 0)),
        scratch_shapes=[
            pltpu.VMEM((T_CHUNK * B_BLK, 4 * H_pad), jnp.float32),   # xg (chunk)
            pltpu.VMEM((T_CHUNK * B_BLK, H_pad), jnp.float32),       # h for all chunk steps
            pltpu.VMEM((B_BLK, H_pad), jnp.float32),                 # h state (carried)
            pltpu.VMEM((B_BLK, H_pad), jnp.float32),                 # c state (carried)
        ],
    )

    out = pl.pallas_call(
        functools.partial(lstm_head_kernel, t_chunk=T_CHUNK, pad_value=float(pad_index)),
        out_shape=jax.ShapeDtypeStruct((n_bblk, T_pad * B_BLK, O_pad), jnp.float32),
        grid_spec=grid_spec,
        compiler_params=pltpu.CompilerParams(
            dimension_semantics=("parallel", "arbitrary"),   # batch blocks -> TCs
            vmem_limit_bytes=vmem_limit),
    )(blk_len, x, mask_p, w_ih_t, w_hh_t, bias, w_out_t, b_out)

    # Undo the block-flattened layout and drop padding.
    out = out.reshape(n_bblk, T_pad, B_BLK, O_pad).transpose(0, 2, 1, 3)
    out = out.reshape(B_pad, T_pad, O_pad)[:B, :T, :O]      # [B, T, O] (batch_first)
    return out


def _reference_forward(params, input_ids, seq_lengths, pad_index):
    """Pure-JAX f32 reference of the same forward pass (correctness check)."""
    seq_lengths = [int(l) for l in seq_lengths]
    t_out = max(seq_lengths)
    emb = jnp.take(params["embedding"], jnp.asarray(input_ids), axis=0)[:, :t_out, :]
    B, T, H = emb.shape
    w_ih_t = params["w_ih"].T
    w_hh_t = params["w_hh"].T
    bias = params["b_ih"] + params["b_hh"]
    lengths = jnp.asarray(seq_lengths, dtype=jnp.int32)

    def step(carry, x_t):
        h, c = carry
        g = x_t @ w_ih_t + h @ w_hh_t + bias
        i = jax.nn.sigmoid(g[:, 0 * H:1 * H])
        f = jax.nn.sigmoid(g[:, 1 * H:2 * H])
        gg = jnp.tanh(g[:, 2 * H:3 * H])
        o = jax.nn.sigmoid(g[:, 3 * H:4 * H])
        c = f * c + i * gg
        h = o * jnp.tanh(c)
        return (h, c), h

    x_tbh = jnp.transpose(emb, (1, 0, 2))
    (_, _), hs = lax.scan(step, (jnp.zeros((B, H)), jnp.zeros((B, H))), x_tbh)
    hs = jnp.transpose(hs, (1, 0, 2))                 # [B, T, H]
    mask = (jnp.arange(T)[None, :] < lengths[:, None])[:, :, None]
    hs = jnp.where(mask, hs, float(pad_index))
    y = hs @ params["w_out"].T + params["b_out"]
    return jax.nn.log_softmax(y, axis=2)


if __name__ == "__main__":
    vocab_size, hidden_size, output_size, pad_index, drop_out = 20, 32, 6, 0, 0.1
    B, T = 2, 8

    key = jax.random.PRNGKey(0)
    ks = jax.random.split(key, 8)
    params = {
        "embedding": jax.random.normal(ks[0], (vocab_size, hidden_size), jnp.float32) * 0.1,
        "w_ih": jax.random.normal(ks[1], (4 * hidden_size, hidden_size), jnp.float32) * 0.1,
        "w_hh": jax.random.normal(ks[2], (4 * hidden_size, hidden_size), jnp.float32) * 0.1,
        "b_ih": jax.random.normal(ks[3], (4 * hidden_size,), jnp.float32) * 0.1,
        "b_hh": jax.random.normal(ks[4], (4 * hidden_size,), jnp.float32) * 0.1,
        "w_out": jax.random.normal(ks[5], (output_size, hidden_size), jnp.float32) * 0.1,
        "b_out": jax.random.normal(ks[6], (output_size,), jnp.float32) * 0.1,
    }

    input_ids = jax.random.randint(ks[7], (B, T), 0, vocab_size, dtype=jnp.int32)
    seq_lengths = [8, 5]   # sorted descending, as pack_padded_sequence requires

    out = language_recognition_rnn_forward(params, input_ids, seq_lengths, pad_index)
    out = jax.block_until_ready(out)

    ref = _reference_forward(params, input_ids, seq_lengths, pad_index)
    # bf16 MXU operands (f32 accumulation/state) => small drift vs f32 reference.
    np.testing.assert_allclose(np.asarray(out), np.asarray(ref), rtol=3e-2, atol=3e-2)

    print("KERNEL_OK")
</pallas_src>

<mosaic_0001>
module attributes {stable_mosaic.version = 11 : i64} {
  func.func @lstm_head_kernel(%arg0: i32, %arg1: i32, %arg2: memref<1xi32, #tpu.memory_space<smem>>, %arg3: memref<1x64x128xbf16, #tpu.memory_space<vmem>>, %arg4: memref<1x64x1xf32, #tpu.memory_space<vmem>>, %arg5: memref<128x512xbf16, #tpu.memory_space<vmem>>, %arg6: memref<128x512xbf16, #tpu.memory_space<vmem>>, %arg7: memref<1x512xf32, #tpu.memory_space<vmem>>, %arg8: memref<128x128xbf16, #tpu.memory_space<vmem>>, %arg9: memref<1x128xf32, #tpu.memory_space<vmem>>, %arg10: memref<1x64x128xf32, #tpu.memory_space<vmem>>, %arg11: memref<64x512xf32, #tpu.memory_space<vmem>>, %arg12: memref<64x128xf32, #tpu.memory_space<vmem>>, %arg13: memref<8x128xf32, #tpu.memory_space<vmem>>, %arg14: memref<8x128xf32, #tpu.memory_space<vmem>>) attributes {dimension_semantics = [#tpu.dimension_semantics<parallel>, #tpu.dimension_semantics<arbitrary>], iteration_bounds = array<i64: 1, 1>, scalar_prefetch = 1 : i64, scratch_operands = 4 : i64, tpu.core_type = #tpu.core_type<tc>, window_params = [{transform_indices = @transform_0, window_bounds = array<i64: 1, 64, 128>}, {transform_indices = @transform_1, window_bounds = array<i64: 1, 64, 1>}, {pipeline_mode = #tpu.pipeline_mode<synchronous>, transform_indices = @transform_2, window_bounds = array<i64: 128, 512>}, {pipeline_mode = #tpu.pipeline_mode<synchronous>, transform_indices = @transform_3, window_bounds = array<i64: 128, 512>}, {pipeline_mode = #tpu.pipeline_mode<synchronous>, transform_indices = @transform_4, window_bounds = array<i64: 1, 512>}, {pipeline_mode = #tpu.pipeline_mode<synchronous>, transform_indices = @transform_5, window_bounds = array<i64: 128, 128>}, {pipeline_mode = #tpu.pipeline_mode<synchronous>, transform_indices = @transform_6, window_bounds = array<i64: 1, 128>}, {transform_indices = @transform_7, window_bounds = array<i64: 1, 64, 128>}]} {
    %c0_i32 = arith.constant 0 : i32
    %0 = arith.cmpi eq, %arg1, %c0_i32 : i32
    %1 = arith.extui %0 : i1 to i32
    %c0_i32_0 = arith.constant 0 : i32
    %2 = arith.cmpi ne, %1, %c0_i32_0 : i32
    scf.if %2 {
      %cst_20 = arith.constant 0.000000e+00 : f32
      %41 = vector.broadcast %cst_20 : f32 to vector<8x128xf32>
      %c0_21 = arith.constant 0 : index
      %c0_22 = arith.constant 0 : index
      %42 = vector.load %arg13[%c0_21, %c0_22] : memref<8x128xf32, #tpu.memory_space<vmem>>, vector<8x128xf32>
      tpu.vector_store %arg13[%c0_21, %c0_22], %41 {strides = array<i32>} : memref<8x128xf32, #tpu.memory_space<vmem>>, vector<8x128xf32>,
      %cst_23 = arith.constant 0.000000e+00 : f32
      %43 = vector.broadcast %cst_23 : f32 to vector<8x128xf32>
      %c0_24 = arith.constant 0 : index
      %c0_25 = arith.constant 0 : index
      %44 = vector.load %arg14[%c0_24, %c0_25] : memref<8x128xf32, #tpu.memory_space<vmem>>, vector<8x128xf32>
      tpu.vector_store %arg14[%c0_24, %c0_25], %43 {strides = array<i32>} : memref<8x128xf32, #tpu.memory_space<vmem>>, vector<8x128xf32>,
    } else {
    }
    %3 = arith.index_cast %arg0 : i32 to index
    %4 = memref.load %arg2[%3] : memref<1xi32, #tpu.memory_space<smem>>
    %c8_i32 = arith.constant 8 : i32
    %5 = arith.muli %arg1, %c8_i32 : i32
    %6 = arith.subi %4, %5 : i32
    %c0_i32_1 = arith.constant 0 : i32
    %7 = arith.maxsi %6, %c0_i32_1 : i32
    %c8_i32_2 = arith.constant 8 : i32
    %8 = arith.minsi %7, %c8_i32_2 : i32
    %c0_i32_3 = arith.constant 0 : i32
    %9 = arith.cmpi sgt, %8, %c0_i32_3 : i32
    %10 = arith.extui %9 : i1 to i32
    %c0_i32_4 = arith.constant 0 : i32
    %11 = arith.cmpi ne, %10, %c0_i32_4 : i32
    scf.if %11 {
      %c0_20 = arith.constant 0 : index
      %c0_21 = arith.constant 0 : index
      %c0_22 = arith.constant 0 : index
      %41 = vector.load %arg3[%c0_20, %c0_21, %c0_22] : memref<1x64x128xbf16, #tpu.memory_space<vmem>>, vector<1x64x128xbf16>
      %42 = vector.shape_cast %41 : vector<1x64x128xbf16> to vector<64x128xbf16>
      %c0_23 = arith.constant 0 : index
      %c0_24 = arith.constant 0 : index
      %43 = vector.load %arg5[%c0_23, %c0_24] : memref<128x512xbf16, #tpu.memory_space<vmem>>, vector<128x512xbf16>
      %cst_25 = arith.constant dense<0.000000e+00> : vector<64x512xf32>
      %44 = tpu.matmul %42, %43, %cst_25 {dimension_numbers = #tpu.dot_dimension_numbers<[1], [0], [0], [1], [0, 0, 1, 1], [], []>} : vector<64x128xbf16>, vector<128x512xbf16>, vector<64x512xf32> -> vector<64x512xf32>
      %c0_26 = arith.constant 0 : index
      %c0_27 = arith.constant 0 : index
      %45 = vector.load %arg7[%c0_26, %c0_27] : memref<1x512xf32, #tpu.memory_space<vmem>>, vector<1x512xf32>
      %46 = vector.broadcast %45 : vector<1x512xf32> to vector<64x512xf32>
      %47 = arith.addf %44, %46 : vector<64x512xf32>
      %c0_28 = arith.constant 0 : index
      %c0_29 = arith.constant 0 : index
      %48 = vector.load %arg11[%c0_28, %c0_29] : memref<64x512xf32, #tpu.memory_space<vmem>>, vector<64x512xf32>
      tpu.vector_store %arg11[%c0_28, %c0_29], %47 {strides = array<i32>} : memref<64x512xf32, #tpu.memory_space<vmem>>, vector<64x512xf32>,
      %c0_i32_30 = arith.constant 0 : i32
      %c0_i32_31 = arith.constant 0 : i32
      %49 = arith.subi %8, %c0_i32_31 : i32
      %50 = arith.addi %c0_i32_31, %49 : i32
      %c1_i32 = arith.constant 1 : i32
      scf.for %arg15 = %c0_i32_31 to %50 step %c1_i32  : i32 {
        %c8_i32_32 = arith.constant 8 : i32
        %51 = arith.muli %arg15, %c8_i32_32 : i32
        %52 = tpu.assume_multiple %51, 8 : i32
        %53 = arith.index_cast %52 : i32 to index
        %c0_33 = arith.constant 0 : index
        %54 = vector.load %arg11[%53, %c0_33] : memref<64x512xf32, #tpu.memory_space<vmem>>, vector<8x512xf32>
        %c0_34 = arith.constant 0 : index
        %c0_35 = arith.constant 0 : index
        %55 = vector.load %arg13[%c0_34, %c0_35] : memref<8x128xf32, #tpu.memory_space<vmem>>, vector<8x128xf32>
        %56 = arith.truncf %55 : vector<8x128xf32> to vector<8x128xbf16>
        %c0_36 = arith.constant 0 : index
        %c0_37 = arith.constant 0 : index
        %57 = vector.load %arg6[%c0_36, %c0_37] : memref<128x512xbf16, #tpu.memory_space<vmem>>, vector<128x512xbf16>
        %cst_38 = arith.constant dense<0.000000e+00> : vector<8x512xf32>
        %58 = tpu.matmul %56, %57, %cst_38 {dimension_numbers = #tpu.dot_dimension_numbers<[1], [0], [0], [1], [0, 0, 1, 1], [], []>} : vector<8x128xbf16>, vector<128x512xbf16>, vector<8x512xf32> -> vector<8x512xf32>
        %59 = arith.addf %54, %58 : vector<8x512xf32>
        %60 = vector.extract_strided_slice %59 {offsets = [0, 0], sizes = [8, 128], strides = [1, 1]} : vector<8x512xf32> to vector<8x128xf32>
        %61 = arith.negf %60 : vector<8x128xf32>
        %62 = math.exp %61 : vector<8x128xf32>
        %cst_39 = arith.constant 1.000000e+00 : f32
        %63 = vector.broadcast %cst_39 : f32 to vector<8x128xf32>
        %64 = arith.addf %63, %62 : vector<8x128xf32>
        %65 = arith.divf %63, %64 : vector<8x128xf32>
        %66 = vector.extract_strided_slice %59 {offsets = [0, 128], sizes = [8, 128], strides = [1, 1]} : vector<8x512xf32> to vector<8x128xf32>
        %67 = arith.negf %66 : vector<8x128xf32>
        %68 = math.exp %67 : vector<8x128xf32>
        %cst_40 = arith.constant 1.000000e+00 : f32
        %69 = vector.broadcast %cst_40 : f32 to vector<8x128xf32>
        %70 = arith.addf %69, %68 : vector<8x128xf32>
        %71 = arith.divf %69, %70 : vector<8x128xf32>
        %72 = vector.extract_strided_slice %59 {offsets = [0, 256], sizes = [8, 128], strides = [1, 1]} : vector<8x512xf32> to vector<8x128xf32>
        %73 = math.tanh %72 : vector<8x128xf32>
        %74 = vector.extract_strided_slice %59 {offsets = [0, 384], sizes = [8, 128], strides = [1, 1]} : vector<8x512xf32> to vector<8x128xf32>
        %75 = arith.negf %74 : vector<8x128xf32>
        %76 = math.exp %75 : vector<8x128xf32>
        %cst_41 = arith.constant 1.000000e+00 : f32
        %77 = vector.broadcast %cst_41 : f32 to vector<8x128xf32>
        %78 = arith.addf %77, %76 : vector<8x128xf32>
        %79 = arith.divf %77, %78 : vector<8x128xf32>
        %c0_42 = arith.constant 0 : index
        %c0_43 = arith.constant 0 : index
        %80 = vector.load %arg14[%c0_42, %c0_43] : memref<8x128xf32, #tpu.memory_space<vmem>>, vector<8x128xf32>
        %81 = arith.mulf %71, %80 : vector<8x128xf32>
        %82 = arith.mulf %65, %73 : vector<8x128xf32>
        %83 = arith.addf %81, %82 : vector<8x128xf32>
        %84 = math.tanh %83 : vector<8x128xf32>
        %85 = arith.mulf %79, %84 : vector<8x128xf32>
        %c0_44 = arith.constant 0 : index
        %c0_45 = arith.constant 0 : index
        %86 = vector.load %arg14[%c0_44, %c0_45] : memref<8x128xf32, #tpu.memory_space<vmem>>, vector<8x128xf32>
        tpu.vector_store %arg14[%c0_44, %c0_45], %83 {strides = array<i32>} : memref<8x128xf32, #tpu.memory_space<vmem>>, vector<8x128xf32>,
        %c0_46 = arith.constant 0 : index
        %c0_47 = arith.constant 0 : index
        %87 = vector.load %arg13[%c0_46, %c0_47] : memref<8x128xf32, #tpu.memory_space<vmem>>, vector<8x128xf32>
        tpu.vector_store %arg13[%c0_46, %c0_47], %85 {strides = array<i32>} : memref<8x128xf32, #tpu.memory_space<vmem>>, vector<8x128xf32>,
        %88 = arith.index_cast %52 : i32 to index
        %c0_48 = arith.constant 0 : index
        %89 = vector.load %arg12[%88, %c0_48] : memref<64x128xf32, #tpu.memory_space<vmem>>, vector<8x128xf32>
        tpu.vector_store %arg12[%88, %c0_48], %85 {strides = array<i32>} : memref<64x128xf32, #tpu.memory_space<vmem>>, vector<8x128xf32>,
      }
    } else {
    }
    %c0 = arith.constant 0 : index
    %c0_5 = arith.constant 0 : index
    %c0_6 = arith.constant 0 : index
    %12 = vector.load %arg4[%c0, %c0_5, %c0_6] : memref<1x64x1xf32, #tpu.memory_space<vmem>>, vector<1x64x1xf32>
    %13 = vector.shape_cast %12 : vector<1x64x1xf32> to vector<64x1xf32>
    %cst = arith.constant 0.000000e+00 : f32
    %14 = vector.broadcast %cst : f32 to vector<64x1xf32>
    %15 = arith.cmpf ogt, %13, %14 : vector<64x1xf32>
    %c0_7 = arith.constant 0 : index
    %c0_8 = arith.constant 0 : index
    %16 = vector.load %arg12[%c0_7, %c0_8] : memref<64x128xf32, #tpu.memory_space<vmem>>, vector<64x128xf32>
    %cst_9 = arith.constant 0.000000e+00 : f32
    %17 = vector.shape_cast %15 : vector<64x1xi1> to vector<64x1xi1>
    %18 = vector.broadcast %17 : vector<64x1xi1> to vector<64x128xi1>
    %19 = vector.broadcast %cst_9 : f32 to vector<64x128xf32>
    %20 = arith.select %18, %16, %19 : vector<64x128xi1>, vector<64x128xf32>
    %21 = arith.truncf %20 : vector<64x128xf32> to vector<64x128xbf16>
    %c0_10 = arith.constant 0 : index
    %c0_11 = arith.constant 0 : index
    %22 = vector.load %arg8[%c0_10, %c0_11] : memref<128x128xbf16, #tpu.memory_space<vmem>>, vector<128x128xbf16>
    %cst_12 = arith.constant dense<0.000000e+00> : vector<64x128xf32>
    %23 = tpu.matmul %21, %22, %cst_12 {dimension_numbers = #tpu.dot_dimension_numbers<[1], [0], [0], [1], [0, 0, 1, 1], [], []>} : vector<64x128xbf16>, vector<128x128xbf16>, vector<64x128xf32> -> vector<64x128xf32>
    %c0_13 = arith.constant 0 : index
    %c0_14 = arith.constant 0 : index
    %24 = vector.load %arg9[%c0_13, %c0_14] : memref<1x128xf32, #tpu.memory_space<vmem>>, vector<1x128xf32>
    %25 = vector.broadcast %24 : vector<1x128xf32> to vector<64x128xf32>
    %26 = arith.addf %23, %25 : vector<64x128xf32>
    %cst_15 = arith.constant dense<0xFF800000> : vector<64xf32>
    %27 = vector.multi_reduction <maximumf>, %26, %cst_15 [1] : vector<64x128xf32> to vector<64xf32>
    %28 = vector.shape_cast %27 : vector<64xf32> to vector<64x1xf32>
    %29 = vector.broadcast %28 : vector<64x1xf32> to vector<64x128xf32>
    %30 = arith.subf %26, %29 : vector<64x128xf32>
    %31 = math.exp %30 : vector<64x128xf32>
    %cst_16 = arith.constant dense<0.000000e+00> : vector<64xf32>
    %32 = vector.multi_reduction <add>, %31, %cst_16 [1] : vector<64x128xf32> to vector<64xf32>
    %33 = vector.shape_cast %32 : vector<64xf32> to vector<64x1xf32>
    %34 = math.log %33 : vector<64x1xf32>
    %35 = arith.addf %28, %34 : vector<64x1xf32>
    %36 = vector.broadcast %35 : vector<64x1xf32> to vector<64x128xf32>
    %37 = arith.subf %26, %36 : vector<64x128xf32>
    %c0_17 = arith.constant 0 : index
    %c0_18 = arith.constant 0 : index
    %c0_19 = arith.constant 0 : index
    %38 = vector.load %arg10[%c0_17, %c0_18, %c0_19] : memref<1x64x128xf32, #tpu.memory_space<vmem>>, vector<1x64x128xf32>
    %39 = vector.shape_cast %38 : vector<1x64x128xf32> to vector<64x128xf32>
    %40 = vector.shape_cast %37 : vector<64x128xf32> to vector<1x64x128xf32>
    tpu.vector_store %arg10[%c0_17, %c0_18, %c0_19], %40 {strides = array<i32>} : memref<1x64x128xf32, #tpu.memory_space<vmem>>, vector<1x64x128xf32>,
    return
  }
  func.func @transform_0(%arg0: i32, %arg1: i32, %arg2: memref<1xi32, #tpu.memory_space<smem>>) -> (i32, i32, i32) {
    %c0_i32 = arith.constant 0 : i32
    %c0_i32_0 = arith.constant 0 : i32
    return %arg0, %arg1, %c0_i32 : i32, i32, i32
  }
  func.func @transform_1(%arg0: i32, %arg1: i32, %arg2: memref<1xi32, #tpu.memory_space<smem>>) -> (i32, i32, i32) {
    %c0_i32 = arith.constant 0 : i32
    %c0_i32_0 = arith.constant 0 : i32
    return %arg0, %arg1, %c0_i32 : i32, i32, i32
  }
  func.func @transform_2(%arg0: i32, %arg1: i32, %arg2: memref<1xi32, #tpu.memory_space<smem>>) -> (i32, i32) {
    %c0_i32 = arith.constant 0 : i32
    %c0_i32_0 = arith.constant 0 : i32
    %c0_i32_1 = arith.constant 0 : i32
    return %c0_i32, %c0_i32_0 : i32, i32
  }
  func.func @transform_3(%arg0: i32, %arg1: i32, %arg2: memref<1xi32, #tpu.memory_space<smem>>) -> (i32, i32) {
    %c0_i32 = arith.constant 0 : i32
    %c0_i32_0 = arith.constant 0 : i32
    %c0_i32_1 = arith.constant 0 : i32
    return %c0_i32, %c0_i32_0 : i32, i32
  }
  func.func @transform_4(%arg0: i32, %arg1: i32, %arg2: memref<1xi32, #tpu.memory_space<smem>>) -> (i32, i32) {
    %c0_i32 = arith.constant 0 : i32
    %c0_i32_0 = arith.constant 0 : i32
    %c0_i32_1 = arith.constant 0 : i32
    return %c0_i32, %c0_i32_0 : i32, i32
  }
  func.func @transform_5(%arg0: i32, %arg1: i32, %arg2: memref<1xi32, #tpu.memory_space<smem>>) -> (i32, i32) {
    %c0_i32 = arith.constant 0 : i32
    %c0_i32_0 = arith.constant 0 : i32
    %c0_i32_1 = arith.constant 0 : i32
    return %c0_i32, %c0_i32_0 : i32, i32
  }
  func.func @transform_6(%arg0: i32, %arg1: i32, %arg2: memref<1xi32, #tpu.memory_space<smem>>) -> (i32, i32) {
    %c0_i32 = arith.constant 0 : i32
    %c0_i32_0 = arith.constant 0 : i32
    %c0_i32_1 = arith.constant 0 : i32
    return %c0_i32, %c0_i32_0 : i32, i32
  }
  func.func @transform_7(%arg0: i32, %arg1: i32, %arg2: memref<1xi32, #tpu.memory_space<smem>>) -> (i32, i32, i32) {
    %c0_i32 = arith.constant 0 : i32
    %c0_i32_0 = arith.constant 0 : i32
    return %arg0, %arg1, %c0_i32 : i32, i32, i32
  }
}

</mosaic_0001>

<bundles_post_ra>
// kernel: tpu_custom_call.1
= control target key start
LH: loop header
LB: loop body
LE: loop exit
PB: predicated region body
PF: predicated region fallthrough
CT: control target
= control target key end

     0   :  { %14 = vsyncpa [#allocation9], 0  ;;  %s1924_s0 = inlined_call_operand.<no memory space> [shape: s32[1], index: 0, kind: input, shape index: {}]   ;;  %s1925_s1 = inlined_call_operand.hbm [shape: bf16[1,64,128], index: 1, kind: input, shape index: {}]   ;;  %s1926_s2 = inlined_call_operand.vmem [shape: f32[1,64,1], index: 2, kind: input, shape index: {}]   ;;  %s1927_s3 = inlined_call_operand.hbm [shape: bf16[128,512], index: 3, kind: input, shape index: {}]   ;;  %s1928_s4 = inlined_call_operand.hbm [shape: bf16[128,512], index: 4, kind: input, shape index: {}]   ;;  %s1929_s5 = inlined_call_operand.vmem [shape: f32[1,512], index: 5, kind: input, shape index: {}]   ;;  %s1930_s6 = inlined_call_operand.vmem [shape: bf16[128,128], index: 6, kind: input, shape index: {}]   ;;  %s1931_s7 = inlined_call_operand.vmem [shape: f32[1,128], index: 7, kind: input, shape index: {}]   ;;  %s1932_s8 = inlined_call_operand.hbm [shape: f32[1,64,128], index: 8, kind: output, shape index: {}]  }
   0x1   :  { %15 = vsyncpa [#allocation12], 0 }
   0x2   :  { %16 = vsyncpa [#allocation10], 0  ;;  %s1611_s27 = smov [#allocation11]   ;;  %s1509_s9 = scalar_lea.hbm %s1927_s3, 4096 }
   0x3   :  { %s36_s28 = sshll.u32 %s1611_s27, 4  ;;  %p1510_p0 = scmp.ne.s32.totalorder %s1927_s3, %s1509_s9  ;;  %s37_s28 = int_to_ptr.vmem [resolvable:$true] %s36_s28 }
   0x4   :  { %p1513_p1 = scmp.lt.u32.totalorder %s1509_s9, %s1927_s3 }
   0x6   :  { %p1515_p2 = pnand %p1513_p1, %p1510_p0 }
   0x8   :  { %1518 = shalt.err (!%p1515_p2)
}
   0x9   :  { %s1519_s14 = scalar_lea.vmem %s37_s28, 4096  ;;  %p1524_p4 = scmp.lt.s32.totalorder %s37_s28, %s37_s28 }
   0xa   :  { %p1520_p3 = scmp.ne.s32.totalorder %s37_s28, %s1519_s14  ;;  %p1525_p5 = scmp.lt.s32.totalorder %s1519_s14, %s1519_s14 }
   0xc   :  { %p1526_p6 = por %p1525_p5, %p1524_p4 }
   0xe   :  { %p1527_p7 = pnand %p1526_p6, %p1520_p3 }
  0x10   :  { %1530 = shalt.err (!%p1527_p7)
}
  0x11   :  { %s1612_s15 = smov 256   ;;  %s1613_s16 = smov 16  }
  0x12   :  { %42 = dma.hbm_to_vmem [thread:$0]  %s1927_s3, 4096, %s37_s28, [#allocation12], %s1612_s15, %s1612_s15, %s1613_s16  }
  0x13   :  { %s1614_s19 = smov [#allocation8]   ;;  %s1531_s23 = scalar_lea.hbm %s1925_s1, 512 }
  0x14   :  { %s22_s20 = sshll.u32 %s1614_s19, 4  ;;  %p1532_p8 = scmp.ne.s32.totalorder %s1925_s1, %s1531_s23  ;;  %s23_s20 = int_to_ptr.vmem [resolvable:$true] %s22_s20 }
  0x15   :  { %p1535_p9 = scmp.lt.u32.totalorder %s1531_s23, %s1925_s1 }
  0x17   :  { %p1537_p10 = pnand %p1535_p9, %p1532_p8 }
  0x19   :  { %1540 = shalt.err (!%p1537_p10)
}
  0x1a   :  { %s1541_s29 = scalar_lea.vmem %s23_s20, 512  ;;  %p1546_p12 = scmp.lt.s32.totalorder %s23_s20, %s23_s20 }
  0x1b   :  { %p1542_p11 = scmp.ne.s32.totalorder %s23_s20, %s1541_s29  ;;  %p1547_p13 = scmp.lt.s32.totalorder %s1541_s29, %s1541_s29 }
  0x1d   :  { %p1548_p0 = por %p1547_p13, %p1546_p12 }
  0x1f   :  { %p1549_p1 = pnand %p1548_p0, %p1542_p11 }
  0x21   :  { %1552 = shalt.err (!%p1549_p1)
}
  0x22   :  { %s1615_s3 = smov 64   ;;  %s1616_s28 = smov 4  }
  0x23   :  { %28 = dma.hbm_to_vmem [thread:$0]  %s1925_s1, 512, %s23_s20, [#allocation9], %s1615_s3, %s1615_s3, %s1616_s28  }
  0x24   :  { %s1617_s10 = smov [#allocation13]   ;;  %s1553_s14 = scalar_lea.hbm %s1928_s4, 4096 }
  0x25   :  { %s48_s11 = sshll.u32 %s1617_s10, 4  ;;  %p1554_p2 = scmp.ne.s32.totalorder %s1928_s4, %s1553_s14  ;;  %s49_s11 = int_to_ptr.vmem [resolvable:$true] %s48_s11 }
  0x26   :  { %p1557_p3 = scmp.lt.u32.totalorder %s1553_s14, %s1928_s4 }
  0x28   :  { %p1559_p4 = pnand %p1557_p3, %p1554_p2 }
  0x2a   :  { %1562 = shalt.err (!%p1559_p4)
}
  0x2b   :  { %s1563_s22 = scalar_lea.vmem %s49_s11, 4096  ;;  %p1568_p6 = scmp.lt.s32.totalorder %s49_s11, %s49_s11 }
  0x2c   :  { %p1564_p5 = scmp.ne.s32.totalorder %s49_s11, %s1563_s22  ;;  %p1569_p7 = scmp.lt.s32.totalorder %s1563_s22, %s1563_s22 }
  0x2e   :  { %p1570_p8 = por %p1569_p7, %p1568_p6 }
  0x30   :  { %p1571_p9 = pnand %p1570_p8, %p1564_p5 }
  0x32   :  { %1574 = shalt.err (!%p1571_p9)
}
  0x33   :  { %54 = dma.hbm_to_vmem [thread:$0]  %s1928_s4, 4096, %s49_s11, [#allocation12], %s1612_s15, %s1612_s15, %s1613_s16  }
  0x34   :  { %1601 = dma.done.wait [#allocation9], 512  }
  0x35   :  { %1602 = vsyncadd [#allocation9], 4294966784 }
  0x36   :  { %1603 = dma.done.wait [#allocation12], 8192  }
  0x37   :  { %1604 = vsyncadd [#allocation12], 4294959104  ;;  %p80_p10 = scmp.gt.s32.totalorder %s1924_s0, 0  ;;  %p1172_p11 = scmp.lt.s32.totalorder %s1924_s0, 8  ;;  %v1618_v0 = vmov 0.0  }
  0x38   :  { %75 = vst [vmem:[#allocation4] sm:$0xff] %v1618_v0  ;;  %76 = vst [vmem:[#allocation5] sm:$0xff] %v1618_v0 }
  0x39   :  { %s1934_s0 = smov (!%p80_p10, %s1924_s0), 0 }
  0x3a   :  { %s1936_s0 = smov (!%p1172_p11, %s1934_s0), 8 }
  0x3b   :  { %p1177_p12 = scmp.le.s32.totalorder %s1936_s0, 0 }
  0x3c   :  { %v1351_v1 = vld [vmem:[#allocation11 + $0x4] ss:$16 sps:$4 sm:$0xff] (!%p1177_p12)   ;;  %v1353_v2 = vld [vmem:[#allocation11 + $0xc] ss:$16 sps:$4 sm:$0xff] (!%p1177_p12)   ;;  %v1619_v3 = vmov (!%p1177_p12), 0   ;;  %v130_v38 = vlaneseq (!%p1177_p12) }
  0x3d   :  { %87 = sbr.rel (%p1177_p12) target bundleno = 629 (0x275), region = 49  ;;  %366 = vmatprep.mubr.bf16.mxu0 (!%p1177_p12), %v1619_v3  ;;  %439 = vmatprep.mubr.bf16.mxu1 (!%p1177_p12), %v1619_v3  ;;  %v1355_v4 = vld [vmem:[#allocation11] ss:$16 sps:$4 sm:$0xff] (!%p1177_p12)   ;;  %v1356_v5 = vld [vmem:[#allocation11 + $0x8] ss:$16 sps:$4 sm:$0xff] (!%p1177_p12)  }
  0x3e   :  { %334 = vmatprep.subr.bf16.mxu0 (!%p1177_p12), %v1351_v1  ;;  %407 = vmatprep.subr.bf16.mxu1 (!%p1177_p12), %v1353_v2  ;;  %v1357_v6 = vld [vmem:[#allocation11 + $0x24] ss:$16 sps:$4 sm:$0xff] (!%p1177_p12)   ;;  %v1359_v7 = vld [vmem:[#allocation11 + $0x2c] ss:$16 sps:$4 sm:$0xff] (!%p1177_p12)   ;;  %v1361_v8 = vld [vmem:[#allocation11 + $0x20] ss:$16 sps:$4 sm:$0xff] (!%p1177_p12)  }
  0x3f   :  { %335 = vmatpush1.bf16.msra.mxu0 (!%p1177_p12), %v1355_v4  ;;  %408 = vmatpush1.bf16.msra.mxu1 (!%p1177_p12), %v1356_v5  ;;  %v1362_v9 = vld [vmem:[#allocation11 + $0x28] ss:$16 sps:$4 sm:$0xff] (!%p1177_p12)   ;;  %v1363_v10 = vld [vmem:[#allocation11 + $0x44] ss:$16 sps:$4 sm:$0xff] (!%p1177_p12)   ;;  %v1365_v11 = vld [vmem:[#allocation11 + $0x4c] ss:$16 sps:$4 sm:$0xff] (!%p1177_p12)  }
  0x40   :  { %336 = vmatprep.subr.bf16.mxu0 (!%p1177_p12), %v1357_v6  ;;  %409 = vmatprep.subr.bf16.mxu1 (!%p1177_p12), %v1359_v7  ;;  %v1367_v12 = vld [vmem:[#allocation11 + $0x40] ss:$16 sps:$4 sm:$0xff] (!%p1177_p12)   ;;  %v1368_v13 = vld [vmem:[#allocation11 + $0x48] ss:$16 sps:$4 sm:$0xff] (!%p1177_p12)   ;;  %v1369_v14 = vld [vmem:[#allocation11 + $0x64] ss:$16 sps:$4 sm:$0xff] (!%p1177_p12)  }
  0x41   :  { %v1371_v15 = vld [vmem:[#allocation11 + $0x6c] ss:$16 sps:$4 sm:$0xff] (!%p1177_p12)   ;;  %v1373_v16 = vld [vmem:[#allocation11 + $0x60] ss:$16 sps:$4 sm:$0xff] (!%p1177_p12)   ;;  %v1374_v17 = vld [vmem:[#allocation11 + $0x68] ss:$16 sps:$4 sm:$0xff] (!%p1177_p12)  }
  0x42   :  { %v1375_v18 = vld [vmem:[#allocation11 + $0x84] ss:$16 sps:$4 sm:$0xff] (!%p1177_p12)   ;;  %v1377_v19 = vld [vmem:[#allocation11 + $0x8c] ss:$16 sps:$4 sm:$0xff] (!%p1177_p12)   ;;  %v1379_v20 = vld [vmem:[#allocation11 + $0x80] ss:$16 sps:$4 sm:$0xff] (!%p1177_p12)  }
  0x43   :  { %337 = vmatpush1.bf16.msra.mxu0 (!%p1177_p12), %v1361_v8  ;;  %410 = vmatpush1.bf16.msra.mxu1 (!%p1177_p12), %v1362_v9  ;;  %v1380_v21 = vld [vmem:[#allocation11 + $0x88] ss:$16 sps:$4 sm:$0xff] (!%p1177_p12)   ;;  %v1381_v22 = vld [vmem:[#allocation11 + $0xa4] ss:$16 sps:$4 sm:$0xff] (!%p1177_p12)   ;;  %v1383_v23 = vld [vmem:[#allocation11 + $0xac] ss:$16 sps:$4 sm:$0xff] (!%p1177_p12)  }
  0x44   :  { %338 = vmatprep.subr.bf16.mxu0 %v1363_v10  ;;  %411 = vmatprep.subr.bf16.mxu1 %v1365_v11  ;;  %v1385_v24 = vld [vmem:[#allocation11 + $0xa0] ss:$16 sps:$4 sm:$0xff]   ;;  %v1386_v25 = vld [vmem:[#allocation11 + $0xa8] ss:$16 sps:$4 sm:$0xff]   ;;  %v1387_v26 = vld [vmem:[#allocation11 + $0xc4] ss:$16 sps:$4 sm:$0xff]  }
  0x45   :  { %v1389_v27 = vld [vmem:[#allocation11 + $0xcc] ss:$16 sps:$4 sm:$0xff]   ;;  %v1391_v28 = vld [vmem:[#allocation11 + $0xc0] ss:$16 sps:$4 sm:$0xff]   ;;  %v1392_v29 = vld [vmem:[#allocation11 + $0xc8] ss:$16 sps:$4 sm:$0xff]  }
  0x46   :  { %v1393_v30 = vld [vmem:[#allocation11 + $0xe4] ss:$16 sps:$4 sm:$0xff]   ;;  %v1395_v31 = vld [vmem:[#allocation11 + $0xec] ss:$16 sps:$4 sm:$0xff]   ;;  %v1397_v32 = vld [vmem:[#allocation11 + $0xe0] ss:$16 sps:$4 sm:$0xff]  }
  0x47   :  { %339 = vmatpush1.bf16.msra.mxu0 %v1367_v12  ;;  %412 = vmatpush1.bf16.msra.mxu1 %v1368_v13  ;;  %v1398_v33 = vld [vmem:[#allocation11 + $0xe8] ss:$16 sps:$4 sm:$0xff]   ;;  %v1399_v34 = vld [vmem:[#allocation8] sm:$0xff]   ;;  %v1401_v36 = vld [vmem:[#allocation8 + $0x10] sm:$0xff]   ;;  %v131_v39 = vshrl.u32 %v130_v38, 7 }
  0x48   :  { %340 = vmatprep.subr.bf16.mxu0 %v1369_v14  ;;  %413 = vmatprep.subr.bf16.mxu1 %v1371_v15  ;;  %v1400_v35 = vld [vmem:[#allocation8 + $0x8] sm:$0xff]   ;;  %v1402_v37 = vld [vmem:[#allocation8 + $0x18] sm:$0xff]   ;;  %v128_v42 = vld [vmem:[%s1929_s5] sm:$0xf]  ;;  %s1779_s5 = smov (!%p1177_p12), 0  }
  0x49   :  { %v132_v40 = vsub.s32 0, %v131_v39  ;;  %v140_v41 = vsub.s32 2, %v131_v39  ;;  %v136_v43 = vsub.s32 1, %v131_v39  ;;  %v144_v44 = vsub.s32 3, %v131_v39 }
  0x4b   :  { %341 = vmatpush1.bf16.msra.mxu0 %v1373_v16  ;;  %414 = vmatpush1.bf16.msra.mxu1 %v1374_v17  ;;  %v1737_v45 = vrot.slane %v128_v42, %v132_v40  ;;  %v1739_v46 = vrot.slane %v128_v42, %v140_v41  ;;  %v1741_v47 = vrot.slane %v128_v42, %v136_v43 }
  0x4c   :  { %342 = vmatprep.subr.bf16.mxu0 %v1375_v18  ;;  %415 = vmatprep.subr.bf16.mxu1 %v1377_v19  ;;  %v1743_v48 = vrot.slane %v128_v42, %v144_v44 }
  0x4f   :  { %343 = vmatpush1.bf16.msra.mxu0 %v1379_v20  ;;  %416 = vmatpush1.bf16.msra.mxu1 %v1380_v21 }
  0x50   :  { %344 = vmatprep.subr.bf16.mxu0 %v1381_v22  ;;  %417 = vmatprep.subr.bf16.mxu1 %v1383_v23 }
  0x53   :  { %345 = vmatpush1.bf16.msra.mxu0 %v1385_v24  ;;  %418 = vmatpush1.bf16.msra.mxu1 %v1386_v25 }
  0x54   :  { %346 = vmatprep.subr.bf16.mxu0 %v1387_v26  ;;  %419 = vmatprep.subr.bf16.mxu1 %v1389_v27 }
  0x57   :  { %347 = vmatpush1.bf16.msra.mxu0 %v1391_v28  ;;  %420 = vmatpush1.bf16.msra.mxu1 %v1392_v29 }
  0x58   :  { %348 = vmatprep.subr.bf16.mxu0 %v1393_v30  ;;  %421 = vmatprep.subr.bf16.mxu1 %v1395_v31 }
  0x5b   :  { %349 = vmatpush1.bf16.msra.mxu0 %v1397_v32  ;;  %422 = vmatpush1.bf16.msra.mxu1 %v1398_v33 }
  0x5e   :  { %367 = vmatmul.mubr.bf16.vlgmr.msra.gmra.mrb[0].mxu0 %v1399_v34  ;;  %440 = vmatmul.mubr.bf16.vlgmr.msra.gmra.mrb[0].mxu1 %v1399_v34 }
  0x5f   :  { %376 = vmatprep.mubr.bf16.mxu0 %v1619_v3  ;;  %449 = vmatprep.mubr.bf16.mxu1 %v1619_v3 }
  0x66   :  { %377 = vmatmul.mubr.bf16.gmra.mrb[4].mxu0 %v1400_v35  ;;  %450 = vmatmul.mubr.bf16.gmra.mrb[4].mxu1 %v1400_v35 }
  0x67   :  { %386 = vmatprep.mubr.bf16.mxu0 %v1619_v3  ;;  %459 = vmatprep.mubr.bf16.mxu1 %v1619_v3 }
  0x6e   :  { %387 = vmatmul.mubr.bf16.gmra.mrb[8].mxu0 %v1401_v36  ;;  %460 = vmatmul.mubr.bf16.gmra.mrb[8].mxu1 %v1401_v36 }
  0x6f   :  { %396 = vmatprep.mubr.bf16.mxu0 %v1619_v3  ;;  %469 = vmatprep.mubr.bf16.mxu1 %v1619_v3 }
  0x76   :  { %397 = vmatmul.mubr.bf16.gmra.mrb[12].mxu0 %v1402_v37  ;;  %470 = vmatmul.mubr.bf16.gmra.mrb[12].mxu1 %v1402_v37 }
 0x131   :  { %v368_v49 = vpop.f32.mrb[0].mxu0  ;;  %v441_v50 = vpop.f32.mrb[0].mxu1 }
 0x132   :  { %v369_v51 = vadd.f32 %v368_v49, %v1737_v45  ;;  %v442_v52 = vadd.f32 %v441_v50, %v1739_v46  ;;  %v370_v53 = vpop.f32.mrb[1].mxu0  ;;  %v443_v54 = vpop.f32.mrb[1].mxu1 }
 0x133   :  { %v371_v55 = vadd.f32 %v370_v53, %v1741_v47  ;;  %v444_v56 = vadd.f32 %v443_v54, %v1743_v48  ;;  %v372_v57 = vpop.f32.mrb[2].mxu0  ;;  %v445_v58 = vpop.f32.mrb[2].mxu1 }
 0x134   :  { %480 = vst [vmem:[#allocation2] sm:$0xff] %v369_v51  ;;  %482 = vst [vmem:[#allocation2 + $0x10] sm:$0xff] %v442_v52  ;;  %v373_v59 = vadd.f32 %v372_v57, %v1737_v45  ;;  %v446_v60 = vadd.f32 %v445_v58, %v1739_v46  ;;  %v374_v61 = vpop.f32.mrb[3].mxu0  ;;  %v447_v62 = vpop.f32.mrb[3].mxu1 }
 0x135   :  { %481 = vst [vmem:[#allocation2 + $0x8] sm:$0xff] %v371_v55  ;;  %483 = vst [vmem:[#allocation2 + $0x18] sm:$0xff] %v444_v56  ;;  %v375_v63 = vadd.f32 %v374_v61, %v1741_v47  ;;  %v448_v0 = vadd.f32 %v447_v62, %v1743_v48 }
 0x136   :  { %484 = vst [vmem:[#allocation2 + $0x20] sm:$0xff] %v373_v59  ;;  %486 = vst [vmem:[#allocation2 + $0x30] sm:$0xff] %v446_v60 }
 0x137   :  { %485 = vst [vmem:[#allocation2 + $0x28] sm:$0xff] %v375_v63  ;;  %487 = vst [vmem:[#allocation2 + $0x38] sm:$0xff] %v448_v0 }
 0x139   :  { %v378_v1 = vpop.f32.mrb[4].mxu0  ;;  %v451_v2 = vpop.f32.mrb[4].mxu1 }
 0x13a   :  { %v379_v3 = vadd.f32 %v378_v1, %v1737_v45  ;;  %v452_v4 = vadd.f32 %v451_v2, %v1739_v46  ;;  %v380_v5 = vpop.f32.mrb[5].mxu0  ;;  %v453_v6 = vpop.f32.mrb[5].mxu1 }
 0x13b   :  { %v381_v7 = vadd.f32 %v380_v5, %v1741_v47  ;;  %v454_v8 = vadd.f32 %v453_v6, %v1743_v48  ;;  %v382_v9 = vpop.f32.mrb[6].mxu0  ;;  %v455_v10 = vpop.f32.mrb[6].mxu1 }
 0x13c   :  { %488 = vst [vmem:[#allocation2 + $0x40] sm:$0xff] %v379_v3  ;;  %490 = vst [vmem:[#allocation2 + $0x50] sm:$0xff] %v452_v4  ;;  %v383_v11 = vadd.f32 %v382_v9, %v1737_v45  ;;  %v456_v12 = vadd.f32 %v455_v10, %v1739_v46  ;;  %v384_v13 = vpop.f32.mrb[7].mxu0  ;;  %v457_v14 = vpop.f32.mrb[7].mxu1 }
 0x13d   :  { %489 = vst [vmem:[#allocation2 + $0x48] sm:$0xff] %v381_v7  ;;  %491 = vst [vmem:[#allocation2 + $0x58] sm:$0xff] %v454_v8  ;;  %v385_v15 = vadd.f32 %v384_v13, %v1741_v47  ;;  %v458_v16 = vadd.f32 %v457_v14, %v1743_v48 }
 0x13e   :  { %492 = vst [vmem:[#allocation2 + $0x60] sm:$0xff] %v383_v11  ;;  %494 = vst [vmem:[#allocation2 + $0x70] sm:$0xff] %v456_v12 }
 0x13f   :  { %493 = vst [vmem:[#allocation2 + $0x68] sm:$0xff] %v385_v15  ;;  %495 = vst [vmem:[#allocation2 + $0x78] sm:$0xff] %v458_v16 }
 0x141   :  { %v388_v17 = vpop.f32.mrb[8].mxu0  ;;  %v461_v18 = vpop.f32.mrb[8].mxu1 }
 0x142   :  { %v389_v19 = vadd.f32 %v388_v17, %v1737_v45  ;;  %v462_v20 = vadd.f32 %v461_v18, %v1739_v46  ;;  %v390_v21 = vpop.f32.mrb[9].mxu0  ;;  %v463_v22 = vpop.f32.mrb[9].mxu1 }
 0x143   :  { %v391_v23 = vadd.f32 %v390_v21, %v1741_v47  ;;  %v464_v24 = vadd.f32 %v463_v22, %v1743_v48  ;;  %v392_v25 = vpop.f32.mrb[10].mxu0  ;;  %v465_v26 = vpop.f32.mrb[10].mxu1 }
 0x144   :  { %496 = vst [vmem:[#allocation2 + $0x80] sm:$0xff] %v389_v19  ;;  %498 = vst [vmem:[#allocation2 + $0x90] sm:$0xff] %v462_v20  ;;  %v393_v27 = vadd.f32 %v392_v25, %v1737_v45  ;;  %v466_v28 = vadd.f32 %v465_v26, %v1739_v46  ;;  %v394_v29 = vpop.f32.mrb[11].mxu0  ;;  %v467_v30 = vpop.f32.mrb[11].mxu1 }
 0x145   :  { %497 = vst [vmem:[#allocation2 + $0x88] sm:$0xff] %v391_v23  ;;  %499 = vst [vmem:[#allocation2 + $0x98] sm:$0xff] %v464_v24  ;;  %v395_v31 = vadd.f32 %v394_v29, %v1741_v47  ;;  %v468_v32 = vadd.f32 %v467_v30, %v1743_v48 }
 0x146   :  { %500 = vst [vmem:[#allocation2 + $0xa0] sm:$0xff] %v393_v27  ;;  %502 = vst [vmem:[#allocation2 + $0xb0] sm:$0xff] %v466_v28 }
 0x147   :  { %501 = vst [vmem:[#allocation2 + $0xa8] sm:$0xff] %v395_v31  ;;  %503 = vst [vmem:[#allocation2 + $0xb8] sm:$0xff] %v468_v32 }
 0x149   :  { %v398_v33 = vpop.f32.mrb[12].mxu0  ;;  %v471_v34 = vpop.f32.mrb[12].mxu1  ;;  %1169 = sbr.rel (%p1177_p12) target bundleno = 629 (0x275), region = 71 }
 0x14a   :  { %v399_v35 = vadd.f32 %v398_v33, %v1737_v45  ;;  %v472_v36 = vadd.f32 %v471_v34, %v1739_v46  ;;  %v400_v37 = vpop.f32.mrb[13].mxu0  ;;  %v473_v38 = vpop.f32.mrb[13].mxu1 }
 0x14b   :  { %v401_v39 = vadd.f32 %v400_v37, %v1741_v47  ;;  %v474_v40 = vadd.f32 %v473_v38, %v1743_v48  ;;  %v402_v41 = vpop.f32.mrb[14].mxu0  ;;  %v475_v42 = vpop.f32.mrb[14].mxu1 }
 0x14c   :  { %504 = vst [vmem:[#allocation2 + $0xc0] sm:$0xff] %v399_v35  ;;  %506 = vst [vmem:[#allocation2 + $0xd0] sm:$0xff] %v472_v36  ;;  %v403_v43 = vadd.f32 %v402_v41, %v1737_v45  ;;  %v476_v44 = vadd.f32 %v475_v42, %v1739_v46  ;;  %v404_v49 = vpop.f32.mrb[15].mxu0  ;;  %v477_v50 = vpop.f32.mrb[15].mxu1 }
 0x14d   :  { %505 = vst [vmem:[#allocation2 + $0xc8] sm:$0xff] %v401_v39  ;;  %507 = vst [vmem:[#allocation2 + $0xd8] sm:$0xff] %v474_v40  ;;  %v405_v51 = vadd.f32 %v404_v49, %v1741_v47  ;;  %v478_v52 = vadd.f32 %v477_v50, %v1743_v48 }
 0x14e   :  { %508 = vst [vmem:[#allocation2 + $0xe0] sm:$0xff] %v403_v43  ;;  %510 = vst [vmem:[#allocation2 + $0xf0] sm:$0xff] %v476_v44 }
 0x14f   :  { %509 = vst [vmem:[#allocation2 + $0xe8] sm:$0xff] %v405_v51  ;;  %511 = vst [vmem:[#allocation2 + $0xf8] sm:$0xff] %v478_v52 }
 0x150 LB: > { %v1403_v45 = vld [vmem:[#allocation13 + $0x4] ss:$16 sps:$4 sm:$0xff]   ;;  %v1405_v46 = vld [vmem:[#allocation13] ss:$16 sps:$4 sm:$0xff]   ;;  %v1620_v53 = vmov 0   ;;  %s1215_s16 = sshll.u32 %s1609_s5, 3  ;;  %s1609_s5 = sphi %s1779_s5, %s515_s5  }
 0x151   : > { %754 = vmatprep.mubr.bf16.mxu0 %v1620_v53  ;;  %795 = vmatprep.mubr.bf16.mxu1 %v1620_v53  ;;  %v1406_v47 = vld [vmem:[#allocation13 + $0x24] ss:$16 sps:$4 sm:$0xff]   ;;  %v1408_v48 = vld [vmem:[#allocation13 + $0x20] ss:$16 sps:$4 sm:$0xff]   ;;  %v1414_v55 = vld [vmem:[#allocation13 + $0xc] ss:$16 sps:$4 sm:$0xff]  }
 0x152   : > { %722 = vmatprep.subr.bf16.mxu0 %v1403_v45  ;;  %v1409_v54 = vld [vmem:[#allocation13 + $0x44] ss:$16 sps:$4 sm:$0xff]   ;;  %v1417_v56 = vld [vmem:[#allocation13 + $0x8] ss:$16 sps:$4 sm:$0xff]   ;;  %v1411_v57 = vld [vmem:[#allocation13 + $0x40] ss:$16 sps:$4 sm:$0xff]   ;;  %763 = vmatprep.subr.bf16.mxu1 %v1414_v55 }
 0x153   : > { %723 = vmatpush1.bf16.msra.mxu0 %v1405_v46  ;;  %v1412_v58 = vld [vmem:[#allocation13 + $0x64] ss:$16 sps:$4 sm:$0xff]   ;;  %764 = vmatpush1.bf16.msra.mxu1 %v1417_v56  ;;  %v1420_v59 = vld [vmem:[#allocation13 + $0x2c] ss:$16 sps:$4 sm:$0xff]   ;;  %v1423_v60 = vld [vmem:[#allocation13 + $0x28] ss:$16 sps:$4 sm:$0xff]  }
 0x154   : > { %724 = vmatprep.subr.bf16.mxu0 %v1406_v47  ;;  %765 = vmatprep.subr.bf16.mxu1 %v1420_v59  ;;  %v1416_v61 = vld [vmem:[#allocation13 + $0x60] ss:$16 sps:$4 sm:$0xff]   ;;  %v1418_v62 = vld [vmem:[#allocation13 + $0x84] ss:$16 sps:$4 sm:$0xff]   ;;  %v1426_v63 = vld [vmem:[#allocation13 + $0x4c] ss:$16 sps:$4 sm:$0xff]  }
 0x155   : > { %v1429_v0 = vld [vmem:[#allocation13 + $0x48] ss:$16 sps:$4 sm:$0xff]   ;;  %v1432_v1 = vld [vmem:[#allocation13 + $0x6c] ss:$16 sps:$4 sm:$0xff]   ;;  %v1422_v2 = vld [vmem:[#allocation13 + $0x80] ss:$16 sps:$4 sm:$0xff]  }
 0x156   : > { %v1424_v3 = vld [vmem:[#allocation13 + $0xa4] ss:$16 sps:$4 sm:$0xff]   ;;  %v1435_v4 = vld [vmem:[#allocation13 + $0x68] ss:$16 sps:$4 sm:$0xff]   ;;  %v1438_v5 = vld [vmem:[#allocation13 + $0x8c] ss:$16 sps:$4 sm:$0xff]  }
 0x157   : > { %725 = vmatpush1.bf16.msra.mxu0 %v1408_v48  ;;  %766 = vmatpush1.bf16.msra.mxu1 %v1423_v60  ;;  %v1428_v6 = vld [vmem:[#allocation13 + $0xa0] ss:$16 sps:$4 sm:$0xff]   ;;  %v1430_v7 = vld [vmem:[#allocation13 + $0xc4] ss:$16 sps:$4 sm:$0xff]   ;;  %v1441_v8 = vld [vmem:[#allocation13 + $0x88] ss:$16 sps:$4 sm:$0xff]  }
 0x158   : > { %726 = vmatprep.subr.bf16.mxu0 %v1409_v54  ;;  %767 = vmatprep.subr.bf16.mxu1 %v1426_v63  ;;  %v1442_v9 = vld [vmem:[#allocation13 + $0xac] ss:$16 sps:$4 sm:$0xff]   ;;  %v1434_v10 = vld [vmem:[#allocation13 + $0xc0] ss:$16 sps:$4 sm:$0xff]   ;;  %v1436_v11 = vld [vmem:[#allocation13 + $0xe4] ss:$16 sps:$4 sm:$0xff]  }
 0x159   : > { %v1444_v12 = vld [vmem:[#allocation13 + $0xa8] ss:$16 sps:$4 sm:$0xff]   ;;  %v1445_v13 = vld [vmem:[#allocation13 + $0xcc] ss:$16 sps:$4 sm:$0xff]   ;;  %v1440_v14 = vld [vmem:[#allocation13 + $0xe0] ss:$16 sps:$4 sm:$0xff]  }
 0x15a   : > { %v528_v15 = vld [vmem:[#allocation4] sm:$0xff]  ;;  %v1447_v16 = vld [vmem:[#allocation13 + $0xc8] ss:$16 sps:$4 sm:$0xff]   ;;  %v1448_v17 = vld [vmem:[#allocation13 + $0xec] ss:$16 sps:$4 sm:$0xff]   ;;  %s519_s3 = sshra.s32 %s1215_s16, 3 }
 0x15b   : > { %727 = vmatpush1.bf16.msra.mxu0 %v1411_v57  ;;  %768 = vmatpush1.bf16.msra.mxu1 %v1429_v0  ;;  %v529_v18 = vpack.c.bf16 %v528_v15, %v528_v15  ;;  %v1450_v19 = vld [vmem:[#allocation13 + $0xe8] ss:$16 sps:$4 sm:$0xff]   ;;  %s1276_s28 = sshll.u32 %s519_s3, 5  ;;  %s835_s9 = scalar_lea.vmem [#allocation3], %s1215_s16 }
 0x15c   : > { %728 = vmatprep.subr.bf16.mxu0 %v1412_v58  ;;  %769 = vmatprep.subr.bf16.mxu1 %v1432_v1  ;;  %s523_s30 = scalar_lea.vmem [#allocation2], %s1276_s28  ;;  %v827_v49 = vld [vmem:[#allocation5] sm:$0xff]  ;;  %s515_s5 = sadd.s32 1, %s1609_s5  }
 0x15d   : > { %v524_v20 = vld [vmem:[%s523_s30] sm:$0xff]  ;;  %v525_v21 = vld [vmem:[%s523_s30 + $0x8] sm:$0xff]  ;;  %v527_v30 = vld [vmem:[%s523_s30 + $0x18] sm:$0xff]  ;;  %p514_p13 = scmp.ge.s32.totalorder %s515_s5, %s1936_s0 }
 0x15e   : > { %v526_v36 = vld [vmem:[%s523_s30 + $0x10] sm:$0xff] }
 0x15f   : > { %729 = vmatpush1.bf16.msra.mxu0 %v1416_v61  ;;  %770 = vmatpush1.bf16.msra.mxu1 %v1435_v4 }
 0x160   : > { %730 = vmatprep.subr.bf16.mxu0 %v1418_v62  ;;  %771 = vmatprep.subr.bf16.mxu1 %v1438_v5 }
 0x163   : > { %731 = vmatpush1.bf16.msra.mxu0 %v1422_v2  ;;  %772 = vmatpush1.bf16.msra.mxu1 %v1441_v8 }
 0x164   : > { %732 = vmatprep.subr.bf16.mxu0 %v1424_v3  ;;  %773 = vmatprep.subr.bf16.mxu1 %v1442_v9 }
 0x167   : > { %733 = vmatpush1.bf16.msra.mxu0 %v1428_v6  ;;  %774 = vmatpush1.bf16.msra.mxu1 %v1444_v12 }
 0x168   : > { %734 = vmatprep.subr.bf16.mxu0 %v1430_v7  ;;  %775 = vmatprep.subr.bf16.mxu1 %v1445_v13 }
 0x16b   : > { %735 = vmatpush1.bf16.msra.mxu0 %v1434_v10  ;;  %776 = vmatpush1.bf16.msra.mxu1 %v1447_v16 }
 0x16c   : > { %736 = vmatprep.subr.bf16.mxu0 %v1436_v11  ;;  %777 = vmatprep.subr.bf16.mxu1 %v1448_v17 }
 0x16f   : > { %737 = vmatpush1.bf16.msra.mxu0 %v1440_v14  ;;  %778 = vmatpush1.bf16.msra.mxu1 %v1450_v19 }
 0x172   : > { %755 = vmatmul.mubr.bf16.vlgmr.msra.gmra.mrb[0].mxu0 %v529_v18  ;;  %796 = vmatmul.mubr.bf16.vlgmr.msra.gmra.mrb[0].mxu1 %v529_v18 }
 0x245   : > { %v756_v22 = vpop.f32.mrb[0].mxu0  ;;  %v797_v31 = vpop.f32.mrb[0].mxu1 }
 0x246   : > { %v804_v23 = vadd.f32 %v756_v22, %v524_v20  ;;  %v758_v24 = vpop.f32.mrb[1].mxu0  ;;  %v799_v32 = vpop.f32.mrb[1].mxu1  ;;  %v806_v38 = vadd.f32 %v797_v31, %v526_v36 }
 0x247   : > { %v805_v25 = vadd.f32 %v758_v24, %v525_v21  ;;  %v760_v26 = vpop.f32.mrb[2].mxu0  ;;  %v807_v33 = vadd.f32 %v799_v32, %v527_v30  ;;  %v801_v34 = vpop.f32.mrb[2].mxu1 }
 0x248   : > { %v1250_v27 = vmul.f32 -1.442695, %v804_v23  ;;  %v761_v28 = vpop.f32.mrb[3].mxu0  ;;  %v802_v35 = vpop.f32.mrb[3].mxu1 }
 0x249   : > { %v1251_v29 = vmul.f32 -1.442695, %v805_v25  ;;  %v1252_v37 = vmul.f32 -1.442695, %v807_v33 }
 0x24a   : > { %1451 = vpow2.f32 %v1250_v27 }
 0x24b   : > { %1453 = vpow2.f32 %v1251_v29 }
 0x24c   : > { %1455 = vpow2.f32 %v1252_v37 }
 0x24d   : > { %1457 = vtanh.f32 %v806_v38 }
 0x254   : > { %v1452_v39 = vpop.eup %1451 }
 0x255   : > { %v1454_v40 = vpop.eup %1453  ;;  %v811_v41 = vadd.f32 1.0, %v1452_v39 }
 0x256   : > { %v817_v42 = vadd.f32 1.0, %v1454_v40  ;;  %v1456_v43 = vpop.eup %1455 }
 0x257   : > { %1459 = vrcp.f32 %v811_v41  ;;  %v1458_v44 = vpop.eup %1457  ;;  %v824_v51 = vadd.f32 1.0, %v1456_v43 }
 0x258   : > { %1461 = vrcp.f32 %v817_v42 }
 0x259   : > { %1463 = vrcp.f32 %v824_v51 }
 0x261   : > { %v1460_v50 = vpop.eup %1459 }
 0x262   : > { %v1462_v52 = vpop.eup %1461  ;;  %v829_v45 = vmul.f32 %v1460_v50, %v1458_v44 }
 0x263   : > { %v828_v46 = vmul.f32 %v1462_v52, %v827_v49  ;;  %v1464_v47 = vpop.eup %1463 }
 0x265   : > { %v830_v53 = vadd.f32 %v829_v45, %v828_v46 }
 0x267   : > { %1465 = vtanh.f32 %v830_v53  ;;  %833 = vst [vmem:[#allocation5] sm:$0xff] %v830_v53 }
 0x26e   :  { %517 = sbr.rel (!%p514_p13) target bundleno = 336 (0x150), region = 77 }
 0x271   : > { %v1466_v48 = vpop.eup %1465 }
 0x272   : > { %v832_v54 = vmul.f32 %v1466_v48, %v1464_v47 }
 0x274   : > { %834 = vst [vmem:[#allocation4] sm:$0xff] %v832_v54  ;;  %836 = vst [vmem:[%s835_s9] sm:$0xff] %v832_v54 }
 0x275 PF:  { %v841_v55 = vld [vmem:[%s1926_s2 + $0x20] sm:$0xff]  ;;  %v842_v57 = vld [vmem:[%s1926_s2 + $0x28] sm:$0xff]  ;;  %v1621_v58 = vmov 0   ;;  %v840_v60 = vld [vmem:[%s1926_s2 + $0x18] sm:$0xff] }
 0x276   :  { %v837_v56 = vld [vmem:[%s1926_s2] sm:$0xff]  ;;  %1468 = vset.pattern.permute.xlu1 %v1621_v58  ;;  %1467 = vset.pattern.permute.xlu0 %v1621_v58  ;;  %vm849_vm0 = vcmp.gt.f32.partialorder %v841_v55, 0.0  ;;  %vm850_vm2 = vcmp.gt.f32.partialorder %v842_v57, 0.0  ;;  %v838_v59 = vld [vmem:[%s1926_s2 + $0x8] sm:$0xff]  ;;  %v839_v63 = vld [vmem:[%s1926_s2 + $0x10] sm:$0xff]  ;;  %vm848_vm4 = vcmp.gt.f32.partialorder %v840_v60, 0.0 }
 0x277   :  { %vm845_vm1 = vcmp.gt.f32.partialorder %v837_v56, 0.0  ;;  %v865_v61 = vsel %vm849_vm0, 1, %v1621_v58  ;;  %vm846_vm3 = vcmp.gt.f32.partialorder %v838_v59, 0.0  ;;  %v866_v0 = vsel %vm850_vm2, 1, %v1621_v58  ;;  %v844_v2 = vld [vmem:[%s1926_s2 + $0x38] sm:$0xff]  ;;  %v843_v3 = vld [vmem:[%s1926_s2 + $0x30] sm:$0xff] }
 0x278   :  { %v861_v62 = vsel %vm845_vm1, 1, %v1621_v58  ;;  %882 = vperm.xlu1 %1468, %v865_v61   ;;  %v862_v1 = vsel %vm846_vm3, 1, %v1621_v58  ;;  %vm847_vm5 = vcmp.gt.f32.partialorder %v839_v63, 0.0  ;;  %v1469_v4 = vld [vmem:[%s1930_s6] sm:$0xff]   ;;  %v1470_v5 = vld [vmem:[%s1930_s6 + $0x8] sm:$0xff]   ;;  %v864_v6 = vsel %vm848_vm4, 1, %v1621_v58 }
 0x279   :  { %870 = vperm.xlu0 %1467, %v861_v62   ;;  %v863_v7 = vsel %vm847_vm5, 1, %v1621_v58  ;;  %1289 = vmatprep.subr.bf16.mxu0 %v1469_v4  ;;  %vm852_vm6 = vcmp.gt.f32.partialorder %v844_v2, 0.0  ;;  %vm851_vm7 = vcmp.gt.f32.partialorder %v843_v3, 0.0  ;;  %v1471_v8 = vld [vmem:[%s1930_s6 + $0x10] sm:$0xff]   ;;  %v1472_v11 = vld [vmem:[%s1930_s6 + $0x18] sm:$0xff]   ;;  %v1473_v12 = vld [vmem:[%s1930_s6 + $0x20] sm:$0xff]  }
 0x27a   :  { %1313 = vmatprep.subr.bf16.mxu1 %v1469_v4  ;;  %1290 = vmatpush3.bf16.msra.mxu0 %v1469_v4  ;;  %v868_v9 = vsel %vm852_vm6, 1, %v1621_v58  ;;  %v867_v10 = vsel %vm851_vm7, 1, %v1621_v58  ;;  %v1474_v13 = vld [vmem:[%s1930_s6 + $0x28] sm:$0xff]   ;;  %v1475_v14 = vld [vmem:[%s1930_s6 + $0x30] sm:$0xff]   ;;  %v1476_v15 = vld [vmem:[%s1930_s6 + $0x38] sm:$0xff]  }
 0x27b   :  { %1321 = vmatpush3.bf16.msra.mxu1 %v1469_v4  ;;  %1291 = vmatprep.subr.bf16.mxu0 %v1470_v5  ;;  %v853_v18 = vld [vmem:[#allocation3] sm:$0xff]  ;;  %v854_v19 = vld [vmem:[#allocation3 + $0x8] sm:$0xff]  ;;  %v855_v26 = vld [vmem:[#allocation3 + $0x10] sm:$0xff] }
 0x27c   :  { %885 = vperm.xlu1 %1468, %v866_v0   ;;  %1314 = vmatprep.subr.bf16.mxu1 %v1470_v5  ;;  %v857_v20 = vld [vmem:[#allocation3 + $0x20] sm:$0xff]  ;;  %v858_v21 = vld [vmem:[#allocation3 + $0x28] sm:$0xff]  ;;  %v1263_v22 = vpack.c.bf16 %v854_v19, %v853_v18  ;;  %v856_v27 = vld [vmem:[#allocation3 + $0x18] sm:$0xff] }
 0x27d   :  { %873 = vperm.xlu0 %1467, %v862_v1   ;;  %v1269_v25 = vpack.c.bf16 %v858_v21, %v857_v20  ;;  %v1266_v28 = vpack.c.bf16 %v856_v27, %v855_v26  ;;  %v859_v31 = vld [vmem:[#allocation3 + $0x30] sm:$0xff]  ;;  %v860_v32 = vld [vmem:[#allocation3 + $0x38] sm:$0xff]  ;;  %v1253_v36 = vld [vmem:[%s1931_s7] ss:$0 sm:$0xff]  ;;  %s1622_s7 = smov [#allocation14]  }
 0x27e   :  { %1292 = vmatpush3.bf16.msra.mxu0 %v1470_v5  ;;  %v1272_v33 = vpack.c.bf16 %v860_v32, %v859_v31  ;;  %s1150_s17 = sshll.u32 %s1622_s7, 4  ;;  %s1151_s17 = int_to_ptr.vmem [resolvable:$true] %s1150_s17 }
 0x27f   :  { %1322 = vmatpush3.bf16.msra.mxu1 %v1470_v5  ;;  %1293 = vmatprep.subr.bf16.mxu0 %v1471_v8  ;;  %s1575_s0 = scalar_lea.vmem %s1151_s17, 1024  ;;  %p1580_p1 = scmp.lt.s32.totalorder %s1151_s17, %s1151_s17 }
 0x280   :  { %879 = vperm.xlu1 %1468, %v864_v6   ;;  %1315 = vmatprep.subr.bf16.mxu1 %v1471_v8  ;;  %p1576_p0 = scmp.ne.s32.totalorder %s1151_s17, %s1575_s0  ;;  %p1581_p2 = scmp.lt.s32.totalorder %s1575_s0, %s1575_s0 }
 0x281   :  { %876 = vperm.xlu0 %1467, %v863_v7  }
 0x282   :  { %1294 = vmatpush3.bf16.msra.mxu0 %v1471_v8  ;;  %p1582_p3 = por %p1581_p2, %p1580_p1 }
 0x283   :  { %1323 = vmatpush3.bf16.msra.mxu1 %v1471_v8  ;;  %1295 = vmatprep.subr.bf16.mxu0 %v1472_v11 }
 0x284   :  { %891 = vperm.xlu1 %1468, %v868_v9   ;;  %1316 = vmatprep.subr.bf16.mxu1 %v1472_v11  ;;  %p1583_p4 = pnand %p1582_p3, %p1576_p0 }
 0x285   :  { %888 = vperm.xlu0 %1467, %v867_v10  }
 0x286   :  { %1296 = vmatpush3.bf16.msra.mxu0 %v1472_v11 }
 0x287   :  { %1324 = vmatpush3.bf16.msra.mxu1 %v1472_v11  ;;  %1297 = vmatprep.subr.bf16.mxu0 %v1473_v12 }
 0x288   :  { %1317 = vmatprep.subr.bf16.mxu1 %v1473_v12 }
 0x28a   :  { %1298 = vmatpush3.bf16.msra.mxu0 %v1473_v12 }
 0x28b   :  { %1325 = vmatpush3.bf16.msra.mxu1 %v1473_v12  ;;  %1299 = vmatprep.subr.bf16.mxu0 %v1474_v13 }
 0x28c   :  { %1318 = vmatprep.subr.bf16.mxu1 %v1474_v13 }
 0x28e   :  { %1300 = vmatpush3.bf16.msra.mxu0 %v1474_v13 }
 0x28f   :  { %1326 = vmatpush3.bf16.msra.mxu1 %v1474_v13  ;;  %1301 = vmatprep.subr.bf16.mxu0 %v1475_v14 }
 0x290   :  { %1319 = vmatprep.subr.bf16.mxu1 %v1475_v14 }
 0x292   :  { %1302 = vmatpush3.bf16.msra.mxu0 %v1475_v14 }
 0x293   :  { %1327 = vmatpush3.bf16.msra.mxu1 %v1475_v14  ;;  %1303 = vmatprep.subr.bf16.mxu0 %v1476_v15 }
 0x294   :  { %1320 = vmatprep.subr.bf16.mxu1 %v1476_v15 }
 0x296   :  { %1304 = vmatpush3.bf16.msra.mxu0 %v1476_v15 }
 0x297   :  { %1328 = vmatpush3.bf16.msra.mxu1 %v1476_v15 }
 0x2f7   :  { %v883_v16 = vpop.permute.xlu1 %882 }
 0x2f8   :  { %v871_v17 = vpop.permute.xlu0 %870  ;;  %vm897_vm11 = vcmp.eq.s32.totalorder %v883_v16, 1 }
 0x2f9   :  { %vm893_vm8 = vcmp.eq.s32.totalorder %v871_v17, 1 }
 0x2fb   :  { %v886_v23 = vpop.permute.xlu1 %885 }
 0x2fc   :  { %v874_v24 = vpop.permute.xlu0 %873  ;;  %vm898_vm9 = vcmp.eq.s32.totalorder %v886_v23, 1 }
 0x2fd   :  { %vm894_vm10 = vcmp.eq.s32.totalorder %v874_v24, 1  ;;  %vm1268_vm13 = vmpackc.low %vm898_vm9, %vm897_vm11 }
 0x2fe   :  { %vm1262_vm12 = vmpackc.low %vm894_vm10, %vm893_vm8  ;;  %1309 = vmatprep.mubr.msk.bf16.mxu1 %vm1268_vm13, %v1269_v25 }
 0x2ff   :  { %1305 = vmatprep.mubr.msk.bf16.mxu0 %vm1262_vm12, %v1263_v22  ;;  %v880_v29 = vpop.permute.xlu1 %879 }
 0x300   :  { %v877_v30 = vpop.permute.xlu0 %876  ;;  %vm896_vm14 = vcmp.eq.s32.totalorder %v880_v29, 1 }
 0x301   :  { %vm895_vm15 = vcmp.eq.s32.totalorder %v877_v30, 1 }
 0x302   :  { %vm1265_vm0 = vmpackc.low %vm896_vm14, %vm895_vm15 }
 0x303   :  { %1306 = vmatmul.mubr.msk.bf16.vlgmr.msra.gmra.mrb[0].mxu0 %vm1265_vm0, %v1266_v28  ;;  %v892_v34 = vpop.permute.xlu1 %891 }
 0x304   :  { %v889_v35 = vpop.permute.xlu0 %888  ;;  %vm900_vm1 = vcmp.eq.s32.totalorder %v892_v34, 1 }
 0x305   :  { %vm899_vm2 = vcmp.eq.s32.totalorder %v889_v35, 1 }
 0x306   :  { %vm1271_vm3 = vmpackc.low %vm900_vm1, %vm899_vm2 }
 0x307   :  { %1310 = vmatmul.mubr.msk.bf16.vlgmr.msra.gmra.mrb[0].mxu1 %vm1271_vm3, %v1272_v33 }
 0x3d6   :  { %v1307_v37 = vpop.f32.mrb[0].mxu0 }
 0x3d7   :  { %v1844_v38 = vadd.f32 %v1307_v37, %v1253_v36  ;;  %v1018_v39 = vpop.f32.mrb[1].mxu0 }
 0x3d8   :  { %v1308_v40 = vpop.f32.mrb[2].mxu0  ;;  %v1847_v43 = vadd.f32 %v1253_v36, %v1018_v39 }
 0x3d9   :  { %1053 = vmax.xlane.f32.xlu0 %v1844_v38  ;;  %v1021_v41 = vpop.f32.mrb[3].mxu0  ;;  %v1853_v52 = vadd.f32 %v1308_v40, %v1253_v36 }
 0x3da   :  { %v1311_v42 = vpop.f32.mrb[0].mxu1  ;;  %v1855_v45 = vadd.f32 %v1253_v36, %v1021_v41 }
 0x3db   :  { %v1034_v44 = vpop.f32.mrb[1].mxu1  ;;  %v1861_v53 = vadd.f32 %v1311_v42, %v1253_v36 }
 0x3dc   :  { %v1849_v49 = vadd.f32 %v1253_v36, %v1034_v44  ;;  %v1312_v50 = vpop.f32.mrb[2].mxu1 }
 0x3dd   :  { %1049 = vmax.xlane.f32.xlu0 %v1847_v43  ;;  %v1037_v51 = vpop.f32.mrb[3].mxu1  ;;  %v1865_v47 = vadd.f32 %v1312_v50, %v1253_v36 }
 0x3de   :  { %1057 = vmax.xlane.f32.xlu1 %v1849_v49  ;;  %v1859_v46 = vadd.f32 %v1253_v36, %v1037_v51 }
 0x3e1   :  { %1055 = vmax.xlane.f32.xlu0 %v1853_v52 }
 0x3e2   :  { %1051 = vmax.xlane.f32.xlu1 %v1855_v45 }
 0x3e5   :  { %1059 = vmax.xlane.f32.xlu0 %v1859_v46 }
 0x3e6   :  { %1061 = vmax.xlane.f32.xlu1 %v1861_v53 }
 0x3e9   :  { %1063 = vmax.xlane.f32.xlu0 %v1865_v47 }
 0x466   :  { %v1054_v48 = vpop.xlane.xlu0 %1053 }
 0x467   :  { %v1067_v54 = vsub.f32 %v1844_v38, %v1054_v48 }
 0x469   :  { %v1077_v55 = vmul.f32 1.442695, %v1067_v54 }
 0x46a   :  { %v1869_v56 = vpop.xlane.xlu0 %1049 }
 0x46b   :  { %1477 = vpow2.f32 %v1077_v55  ;;  %v1065_v57 = vsub.f32 %v1847_v43, %v1869_v56  ;;  %v1873_v58 = vpop.xlane.xlu1 %1057 }
 0x46c   :  { %v1069_v59 = vsub.f32 %v1849_v49, %v1873_v58 }
 0x46d   :  { %v1073_v60 = vmul.f32 1.442695, %v1065_v57 }
 0x46e   :  { %v1081_v61 = vmul.f32 1.442695, %v1069_v59  ;;  %v1877_v62 = vpop.xlane.xlu0 %1055 }
 0x46f   :  { %1479 = vpow2.f32 %v1073_v60  ;;  %v1068_v63 = vsub.f32 %v1853_v52, %v1877_v62  ;;  %v1881_v0 = vpop.xlane.xlu1 %1051 }
 0x470   :  { %v1066_v1 = vsub.f32 %v1855_v45, %v1881_v0  ;;  %1481 = vpow2.f32 %v1081_v61 }
 0x471   :  { %v1079_v2 = vmul.f32 1.442695, %v1068_v63 }
 0x472   :  { %v1885_v3 = vpop.xlane.xlu0 %1059  ;;  %v1075_v4 = vmul.f32 1.442695, %v1066_v1 }
 0x473   :  { %1483 = vpow2.f32 %v1079_v2  ;;  %v1070_v5 = vsub.f32 %v1859_v46, %v1885_v3  ;;  %v1889_v6 = vpop.xlane.xlu1 %1061 }
 0x474   :  { %v1071_v7 = vsub.f32 %v1861_v53, %v1889_v6  ;;  %1485 = vpow2.f32 %v1075_v4 }
 0x475   :  { %v1478_v8 = vpop.eup %1477  ;;  %v1083_v11 = vmul.f32 1.442695, %v1070_v5 }
 0x476   :  { %v1085_v9 = vmul.f32 1.442695, %v1071_v7  ;;  %1093 = vadd.xlane.f32.xlu1 %v1478_v8  ;;  %v1893_v10 = vpop.xlane.xlu0 %1063 }
 0x477   :  { %v1072_v12 = vsub.f32 %v1865_v47, %v1893_v10 }
 0x478   :  { %1487 = vpow2.f32 %v1085_v9 }
 0x479   :  { %v1480_v13 = vpop.eup %1479  ;;  %1489 = vpow2.f32 %v1083_v11  ;;  %v1087_v14 = vmul.f32 1.442695, %v1072_v12 }
 0x47a   :  { %1089 = vadd.xlane.f32.xlu1 %v1480_v13  ;;  %v1482_v15 = vpop.eup %1481 }
 0x47b   :  { %1491 = vpow2.f32 %v1087_v14 }
 0x47d   :  { %v1484_v16 = vpop.eup %1483 }
 0x47e   :  { %1097 = vadd.xlane.f32.xlu1 %v1482_v15  ;;  %1095 = vadd.xlane.f32.xlu0 %v1484_v16  ;;  %v1486_v17 = vpop.eup %1485 }
 0x482   :  { %v1488_v18 = vpop.eup %1487  ;;  %1091 = vadd.xlane.f32.xlu0 %v1486_v17 }
 0x483   :  { %1101 = vadd.xlane.f32.xlu1 %v1488_v18  ;;  %v1490_v19 = vpop.eup %1489 }
 0x485   :  { %v1492_v20 = vpop.eup %1491 }
 0x486   :  { %1099 = vadd.xlane.f32.xlu0 %v1490_v19 }
 0x48a   :  { %1103 = vadd.xlane.f32.xlu0 %v1492_v20 }
 0x503   :  { %v1094_v21 = vpop.xlane.xlu1 %1093 }
 0x504   :  { %1493 = vlog2.f32 %v1094_v21 }
 0x507   :  { %v1090_v22 = vpop.xlane.xlu1 %1089 }
 0x508   :  { %1495 = vlog2.f32 %v1090_v22 }
 0x50b   :  { %v1098_v23 = vpop.xlane.xlu1 %1097  ;;  %v1096_v24 = vpop.xlane.xlu0 %1095 }
 0x50c   :  { %1497 = vlog2.f32 %v1098_v23 }
 0x50d   :  { %1499 = vlog2.f32 %v1096_v24 }
 0x50e   :  { %v1494_v25 = vpop.eup %1493 }
 0x50f   :  { %v1110_v26 = vmul.f32 0.6931472, %v1494_v25  ;;  %v1092_v27 = vpop.xlane.xlu0 %1091 }
 0x510   :  { %1501 = vlog2.f32 %v1092_v27  ;;  %v1102_v28 = vpop.xlane.xlu1 %1101 }
 0x511   :  { %v1123_v29 = vadd.f32 %v1110_v26, %v1054_v48  ;;  %1503 = vlog2.f32 %v1102_v28 }
 0x512   :  { %v1496_v30 = vpop.eup %1495 }
 0x513   :  { %v1131_v31 = vsub.f32 %v1844_v38, %v1123_v29  ;;  %v1106_v32 = vmul.f32 0.6931472, %v1496_v30  ;;  %v1100_v33 = vpop.xlane.xlu0 %1099 }
 0x514   :  { %1505 = vlog2.f32 %v1100_v33 }
 0x515   :  { %1139 = vst [vmem:[#allocation14 + $0x10] sm:$0xff] %v1131_v31  ;;  %v1121_v34 = vadd.f32 %v1106_v32, %v1869_v56 }
 0x516   :  { %v1498_v35 = vpop.eup %1497 }
 0x517   :  { %v1500_v36 = vpop.eup %1499  ;;  %v1129_v37 = vsub.f32 %v1847_v43, %v1121_v34  ;;  %v1114_v39 = vmul.f32 0.6931472, %v1498_v35  ;;  %v1104_v40 = vpop.xlane.xlu0 %1103 }
 0x518   :  { %v1112_v41 = vmul.f32 0.6931472, %v1500_v36  ;;  %1507 = vlog2.f32 %v1104_v40 }
 0x519   :  { %1137 = vst [vmem:[#allocation14] sm:$0xff] %v1129_v37  ;;  %v1125_v42 = vadd.f32 %v1114_v39, %v1873_v58 }
 0x51a   :  { %v1502_v44 = vpop.eup %1501  ;;  %v1124_v38 = vadd.f32 %v1112_v41, %v1877_v62 }
 0x51b   :  { %v1504_v50 = vpop.eup %1503  ;;  %v1133_v51 = vsub.f32 %v1849_v49, %v1125_v42  ;;  %v1108_v48 = vmul.f32 0.6931472, %v1502_v44 }
 0x51c   :  { %v1132_v54 = vsub.f32 %v1853_v52, %v1124_v38  ;;  %v1118_v55 = vmul.f32 0.6931472, %v1504_v50 }
 0x51d   :  { %1141 = vst [vmem:[#allocation14 + $0x20] sm:$0xff] %v1133_v51  ;;  %v1122_v43 = vadd.f32 %v1108_v48, %v1881_v0 }
 0x51e   :  { %v1506_v56 = vpop.eup %1505  ;;  %1140 = vst [vmem:[#allocation14 + $0x18] sm:$0xff] %v1132_v54  ;;  %v1127_v57 = vadd.f32 %v1118_v55, %v1889_v6 }
 0x51f   :  { %v1130_v59 = vsub.f32 %v1855_v45, %v1122_v43  ;;  %v1116_v58 = vmul.f32 0.6931472, %v1506_v56 }
 0x520   :  { %v1135_v60 = vsub.f32 %v1861_v53, %v1127_v57 }
 0x521   :  { %1138 = vst [vmem:[#allocation14 + $0x8] sm:$0xff] %v1130_v59  ;;  %v1126_v61 = vadd.f32 %v1116_v58, %v1885_v3 }
 0x522   :  { %v1508_v49 = vpop.eup %1507  ;;  %1143 = vst [vmem:[#allocation14 + $0x30] sm:$0xff] %v1135_v60 }
 0x523   :  { %v1134_v52 = vsub.f32 %v1859_v46, %v1126_v61  ;;  %v1120_v62 = vmul.f32 0.6931472, %v1508_v49 }
 0x525   :  { %1142 = vst [vmem:[#allocation14 + $0x28] sm:$0xff] %v1134_v52  ;;  %v1128_v63 = vadd.f32 %v1120_v62, %v1893_v10 }
 0x527   :  { %v1136_v0 = vsub.f32 %v1865_v47, %v1128_v63 }
 0x529   :  { %1144 = vst [vmem:[#allocation14 + $0x38] sm:$0xff] %v1136_v0 }
 0x52a   :  { %1586 = shalt.err (!%p1583_p4)
}
 0x52b   :  { %s1587_s21 = scalar_lea.hbm %s1932_s8, 1024 }
 0x52c   :  { %p1588_p5 = scmp.ne.s32.totalorder %s1932_s8, %s1587_s21  ;;  %p1591_p6 = scmp.lt.u32.totalorder %s1587_s21, %s1932_s8 }
 0x52e   :  { %p1593_p7 = pnand %p1591_p6, %p1588_p5 }
 0x530   :  { %1596 = shalt.err (!%p1593_p7)
}
 0x531   :  { %s1623_s24 = smov 128   ;;  %s1624_s25 = smov 8  }
 0x532   :  { %1156 = dma.vmem_to_hbm [thread:$0]  %s1151_s17, 1024, %s1932_s8, [#allocation10], %s1623_s24, %s1623_s24, %s1624_s25  }
 0x533   :  { %1605 = dma.done.wait [#allocation10], 1024  }
 0x534   :  { %1606 = vsyncadd [#allocation10], 4294966272 }
 0x535   :  { %1160 = vsyncpa [#allocation9], 1 }
 0x536   :  { %1161 = vsyncpa [#allocation12], 1 }
 0x537   :  { %1162 = vsyncpa [#allocation10], 1 }

</bundles_post_ra>
